<compile_context>
chip_gen: v7x
topology: tpu7x:2x2x1
jax: 0.10.0
libtpu: 0.0.40
codegen_flags: <defaults>
</compile_context>

<pallas_src>
import jax
import jax.numpy as jnp
from jax import lax
from jax.experimental import pallas as pl
from jax.experimental.pallas import tpu as pltpu


# ---------------------------------------------------------------------------
# Tile selection
# ---------------------------------------------------------------------------
def _select_tile_lanes(c_in, c_out, itemsize,
                       target_bytes=6 * 1024 * 1024,
                       max_lanes=128 * 1024):
    """Pick an M-tile (in lanes) so one grid step moves ~target_bytes."""
    lanes = target_bytes // max(1, (c_in + c_out) * itemsize)
    lanes = max(1024, min(int(lanes), max_lanes))
    return (lanes // 128) * 128


# ---------------------------------------------------------------------------
# Small-channel (VPU) path: dense (C, G, 128) layout, SMEM scalar weights.
# ---------------------------------------------------------------------------
def _pointwise_conv_small_kernel(w_ref, b_ref, x_ref, o_ref):
    # w_ref: SMEM (C_out*C_in,)   b_ref: SMEM (C_out,)
    # x_ref: VMEM (C_in, TG, 128) o_ref: VMEM (C_out, TG, 128)
    c_in = x_ref.shape[0]
    c_out = o_ref.shape[0]
    for co in range(c_out):
        acc = jnp.zeros(o_ref.shape[1:], jnp.float32)
        for ci in range(c_in):
            wv = w_ref[co * c_in + ci].astype(jnp.float32)
            # Per-channel streaming load; scalar splat * dense (TG, 128) tile.
            acc = acc + wv * x_ref[ci].astype(jnp.float32)
        o_ref[co] = (acc + b_ref[co].astype(jnp.float32)).astype(o_ref.dtype)


def _pointwise_conv_small(x3, weight, bias):
    n, c_in, m = x3.shape
    c_out = bias.shape[0]
    itemsize = x3.dtype.itemsize

    g = -(-m // 128)            # number of 128-lane groups
    m_pad = g * 128
    padded = m_pad != m
    if padded:
        # TODO(synk): rare ragged-M path (M % 128 != 0) costs one extra HBM
        # pass; an in-kernel masked tail store would remove it.
        x3 = jnp.pad(x3, ((0, 0), (0, 0), (0, m_pad - m)))
    x4 = x3.reshape(n, c_in, g, 128)

    # Tile in sublane-group units (multiple of 8 groups, or the full extent).
    lanes = _select_tile_lanes(c_in, c_out, itemsize)
    tg = max(8, (lanes // 128 // 8) * 8)
    if tg >= g:
        tg = g
    grid_g = -(-g // tg)
    # Keep at least 2 grid steps so both v7x TensorCores stream.
    if n * grid_g < 2 and g >= 16:
        tg = max(8, ((g // 2) // 8) * 8)
        grid_g = -(-g // tg)

    out4 = pl.pallas_call(
        _pointwise_conv_small_kernel,
        out_shape=jax.ShapeDtypeStruct((n, c_out, g, 128), x3.dtype),
        grid_spec=pltpu.PrefetchScalarGridSpec(
            num_scalar_prefetch=0,
            grid=(n, grid_g),
            in_specs=[
                # Weights / bias: whole arrays, resident in SMEM (scalar reads).
                pl.BlockSpec(memory_space=pltpu.MemorySpace.SMEM),
                pl.BlockSpec(memory_space=pltpu.MemorySpace.SMEM),
                # x block: squeeze batch, full channels, dense (TG, 128) tile.
                pl.BlockSpec((None, c_in, tg, 128), lambda i, j: (i, 0, j, 0)),
            ],
            out_specs=pl.BlockSpec((None, c_out, tg, 128),
                                   lambda i, j: (i, 0, j, 0)),
        ),
        compiler_params=pltpu.CompilerParams(
            dimension_semantics=("parallel", "parallel"),
            vmem_limit_bytes=32 * 1024 * 1024,
        ),
    )(weight.reshape(c_out * c_in), bias, x4)

    out3 = out4.reshape(n, c_out, m_pad)
    if padded:
        out3 = out3[:, :, :m]
    return out3


# ---------------------------------------------------------------------------
# Large-channel (MXU) path: W (C_out, C_in) @ X (C_in, TM) + b.
# ---------------------------------------------------------------------------
def _pointwise_conv_mxu_kernel(x_ref, w_ref, b_ref, o_ref):
    acc = jnp.dot(w_ref[...], x_ref[...],
                  preferred_element_type=jnp.float32,
                  precision=lax.Precision.HIGHEST)
    o_ref[...] = (acc + b_ref[...].astype(jnp.float32)).astype(o_ref.dtype)


def _pointwise_conv_mxu(x3, weight, bias):
    n, c_in, m = x3.shape
    c_out = bias.shape[0]
    itemsize = x3.dtype.itemsize

    lanes = _select_tile_lanes(c_in, c_out, itemsize)
    tm = min(lanes, -(-m // 128) * 128)       # multiple of 128
    grid_m = -(-m // tm)                      # ragged tail handled by Pallas

    return pl.pallas_call(
        _pointwise_conv_mxu_kernel,
        out_shape=jax.ShapeDtypeStruct((n, c_out, m), x3.dtype),
        grid_spec=pltpu.PrefetchScalarGridSpec(
            num_scalar_prefetch=0,
            grid=(n, grid_m),
            in_specs=[
                pl.BlockSpec((None, c_in, tm), lambda i, j: (i, 0, j)),
                pl.BlockSpec((c_out, c_in), lambda i, j: (0, 0)),
                pl.BlockSpec((c_out, 1), lambda i, j: (0, 0)),
            ],
            out_specs=pl.BlockSpec((None, c_out, tm), lambda i, j: (i, 0, j)),
        ),
        compiler_params=pltpu.CompilerParams(
            dimension_semantics=("parallel", "parallel"),
            vmem_limit_bytes=32 * 1024 * 1024,
        ),
    )(x3, weight, bias.reshape(c_out, 1))


# ---------------------------------------------------------------------------
# Public forward
# ---------------------------------------------------------------------------
@jax.jit
def out_conv_forward(x, weight, bias):
    """1x1x1 Conv3d forward.

    x:      (N, C_in, D, H, W)
    weight: (C_out, C_in)  -- PyTorch Conv3d weight (C_out, C_in, 1, 1, 1) squeezed
    bias:   (C_out,)
    returns (N, C_out, D, H, W)
    """
    n, c_in, d, h, w = x.shape
    c_out = weight.shape[0]
    m = d * h * w
    x3 = x.reshape(n, c_in, m)

    # Tiny-channel heads (the realistic out_conv regime): pure VPU scalar-splat
    # FMAs.  Large channel counts: feed the MXU.
    use_vpu = (c_out <= 8 and c_in <= 64) or (c_in * c_out <= 256)
    if use_vpu:
        out3 = _pointwise_conv_small(x3, weight, bias)
    else:
        out3 = _pointwise_conv_mxu(x3, weight, bias)
    return out3.reshape(n, c_out, d, h, w)


if __name__ == "__main__":
    # Small shapes consistent with Conv3d NCDHW input.
    N, C_IN, C_OUT, D, H, W = 2, 4, 3, 4, 8, 8

    key = jax.random.PRNGKey(0)
    kx, kw, kb = jax.random.split(key, 3)

    x = jax.random.normal(kx, (N, C_IN, D, H, W), dtype=jnp.float32)

    # Mimic PyTorch's default uniform(-1/sqrt(fan_in), 1/sqrt(fan_in)) init.
    bound = 1.0 / (C_IN ** 0.5)
    weight = jax.random.uniform(kw, (C_OUT, C_IN), jnp.float32, -bound, bound)
    bias = jax.random.uniform(kb, (C_OUT,), jnp.float32, -bound, bound)

    out = jax.block_until_ready(out_conv_forward(x, weight, bias))

    # Pure-JAX reference of the same math.
    ref = jnp.einsum("oc,ncdhw->nodhw", weight, x) + bias[None, :, None, None, None]
    assert out.shape == (N, C_OUT, D, H, W)
    assert jnp.allclose(out, ref, atol=1e-5, rtol=1e-5)

    print("KERNEL_OK")
</pallas_src>

<mosaic_0001>
module attributes {stable_mosaic.version = 11 : i64} {
  func.func @_pointwise_conv_small_kernel(%arg0: i32, %arg1: i32, %arg2: memref<12xf32, #tpu.memory_space<smem>>, %arg3: memref<3xf32, #tpu.memory_space<smem>>, %arg4: memref<1x4x2x128xf32, #tpu.memory_space<vmem>>, %arg5: memref<1x3x2x128xf32, #tpu.memory_space<vmem>>) attributes {dimension_semantics = [#tpu.dimension_semantics<parallel>, #tpu.dimension_semantics<parallel>], iteration_bounds = array<i64: 2, 1>, scalar_prefetch = 0 : i64, scratch_operands = 0 : i64, tpu.core_type = #tpu.core_type<tc>, window_params = [{transform_indices = @transform_0, window_bounds = array<i64: 12>}, {transform_indices = @transform_1, window_bounds = array<i64: 3>}, {transform_indices = @transform_2, window_bounds = array<i64: 1, 4, 2, 128>}, {transform_indices = @transform_3, window_bounds = array<i64: 1, 3, 2, 128>}]} {
    %cst = arith.constant 0.000000e+00 : f32
    %0 = vector.broadcast %cst : f32 to vector<2x128xf32>
    %c0 = arith.constant 0 : index
    %1 = memref.load %arg2[%c0] : memref<12xf32, #tpu.memory_space<smem>>
    %c0_0 = arith.constant 0 : index
    %c0_1 = arith.constant 0 : index
    %c0_2 = arith.constant 0 : index
    %c0_3 = arith.constant 0 : index
    %2 = vector.load %arg4[%c0_0, %c0_1, %c0_2, %c0_3] : memref<1x4x2x128xf32, #tpu.memory_space<vmem>>, vector<1x1x2x128xf32>
    %3 = vector.shape_cast %2 : vector<1x1x2x128xf32> to vector<2x128xf32>
    %4 = vector.broadcast %1 : f32 to vector<2x128xf32>
    %5 = arith.mulf %4, %3 : vector<2x128xf32>
    %6 = arith.addf %0, %5 : vector<2x128xf32>
    %c1 = arith.constant 1 : index
    %7 = memref.load %arg2[%c1] : memref<12xf32, #tpu.memory_space<smem>>
    %c0_4 = arith.constant 0 : index
    %c1_5 = arith.constant 1 : index
    %c0_6 = arith.constant 0 : index
    %c0_7 = arith.constant 0 : index
    %8 = vector.load %arg4[%c0_4, %c1_5, %c0_6, %c0_7] : memref<1x4x2x128xf32, #tpu.memory_space<vmem>>, vector<1x1x2x128xf32>
    %9 = vector.shape_cast %8 : vector<1x1x2x128xf32> to vector<2x128xf32>
    %10 = vector.broadcast %7 : f32 to vector<2x128xf32>
    %11 = arith.mulf %10, %9 : vector<2x128xf32>
    %12 = arith.addf %6, %11 : vector<2x128xf32>
    %c2 = arith.constant 2 : index
    %13 = memref.load %arg2[%c2] : memref<12xf32, #tpu.memory_space<smem>>
    %c0_8 = arith.constant 0 : index
    %c2_9 = arith.constant 2 : index
    %c0_10 = arith.constant 0 : index
    %c0_11 = arith.constant 0 : index
    %14 = vector.load %arg4[%c0_8, %c2_9, %c0_10, %c0_11] : memref<1x4x2x128xf32, #tpu.memory_space<vmem>>, vector<1x1x2x128xf32>
    %15 = vector.shape_cast %14 : vector<1x1x2x128xf32> to vector<2x128xf32>
    %16 = vector.broadcast %13 : f32 to vector<2x128xf32>
    %17 = arith.mulf %16, %15 : vector<2x128xf32>
    %18 = arith.addf %12, %17 : vector<2x128xf32>
    %c3 = arith.constant 3 : index
    %19 = memref.load %arg2[%c3] : memref<12xf32, #tpu.memory_space<smem>>
    %c0_12 = arith.constant 0 : index
    %c3_13 = arith.constant 3 : index
    %c0_14 = arith.constant 0 : index
    %c0_15 = arith.constant 0 : index
    %20 = vector.load %arg4[%c0_12, %c3_13, %c0_14, %c0_15] : memref<1x4x2x128xf32, #tpu.memory_space<vmem>>, vector<1x1x2x128xf32>
    %21 = vector.shape_cast %20 : vector<1x1x2x128xf32> to vector<2x128xf32>
    %22 = vector.broadcast %19 : f32 to vector<2x128xf32>
    %23 = arith.mulf %22, %21 : vector<2x128xf32>
    %24 = arith.addf %18, %23 : vector<2x128xf32>
    %c0_16 = arith.constant 0 : index
    %25 = memref.load %arg3[%c0_16] : memref<3xf32, #tpu.memory_space<smem>>
    %26 = vector.broadcast %25 : f32 to vector<2x128xf32>
    %27 = arith.addf %24, %26 : vector<2x128xf32>
    %c0_17 = arith.constant 0 : index
    %c0_18 = arith.constant 0 : index
    %c0_19 = arith.constant 0 : index
    %c0_20 = arith.constant 0 : index
    %28 = vector.load %arg5[%c0_17, %c0_18, %c0_19, %c0_20] : memref<1x3x2x128xf32, #tpu.memory_space<vmem>>, vector<1x1x2x128xf32>
    %29 = vector.shape_cast %28 : vector<1x1x2x128xf32> to vector<2x128xf32>
    %30 = vector.shape_cast %27 : vector<2x128xf32> to vector<1x1x2x128xf32>
    tpu.vector_store %arg5[%c0_17, %c0_18, %c0_19, %c0_20], %30 {strides = array<i32>} : memref<1x3x2x128xf32, #tpu.memory_space<vmem>>, vector<1x1x2x128xf32>,
    %cst_21 = arith.constant 0.000000e+00 : f32
    %31 = vector.broadcast %cst_21 : f32 to vector<2x128xf32>
    %c4 = arith.constant 4 : index
    %32 = memref.load %arg2[%c4] : memref<12xf32, #tpu.memory_space<smem>>
    %c0_22 = arith.constant 0 : index
    %c0_23 = arith.constant 0 : index
    %c0_24 = arith.constant 0 : index
    %c0_25 = arith.constant 0 : index
    %33 = vector.load %arg4[%c0_22, %c0_23, %c0_24, %c0_25] : memref<1x4x2x128xf32, #tpu.memory_space<vmem>>, vector<1x1x2x128xf32>
    %34 = vector.shape_cast %33 : vector<1x1x2x128xf32> to vector<2x128xf32>
    %35 = vector.broadcast %32 : f32 to vector<2x128xf32>
    %36 = arith.mulf %35, %34 : vector<2x128xf32>
    %37 = arith.addf %31, %36 : vector<2x128xf32>
    %c5 = arith.constant 5 : index
    %38 = memref.load %arg2[%c5] : memref<12xf32, #tpu.memory_space<smem>>
    %c0_26 = arith.constant 0 : index
    %c1_27 = arith.constant 1 : index
    %c0_28 = arith.constant 0 : index
    %c0_29 = arith.constant 0 : index
    %39 = vector.load %arg4[%c0_26, %c1_27, %c0_28, %c0_29] : memref<1x4x2x128xf32, #tpu.memory_space<vmem>>, vector<1x1x2x128xf32>
    %40 = vector.shape_cast %39 : vector<1x1x2x128xf32> to vector<2x128xf32>
    %41 = vector.broadcast %38 : f32 to vector<2x128xf32>
    %42 = arith.mulf %41, %40 : vector<2x128xf32>
    %43 = arith.addf %37, %42 : vector<2x128xf32>
    %c6 = arith.constant 6 : index
    %44 = memref.load %arg2[%c6] : memref<12xf32, #tpu.memory_space<smem>>
    %c0_30 = arith.constant 0 : index
    %c2_31 = arith.constant 2 : index
    %c0_32 = arith.constant 0 : index
    %c0_33 = arith.constant 0 : index
    %45 = vector.load %arg4[%c0_30, %c2_31, %c0_32, %c0_33] : memref<1x4x2x128xf32, #tpu.memory_space<vmem>>, vector<1x1x2x128xf32>
    %46 = vector.shape_cast %45 : vector<1x1x2x128xf32> to vector<2x128xf32>
    %47 = vector.broadcast %44 : f32 to vector<2x128xf32>
    %48 = arith.mulf %47, %46 : vector<2x128xf32>
    %49 = arith.addf %43, %48 : vector<2x128xf32>
    %c7 = arith.constant 7 : index
    %50 = memref.load %arg2[%c7] : memref<12xf32, #tpu.memory_space<smem>>
    %c0_34 = arith.constant 0 : index
    %c3_35 = arith.constant 3 : index
    %c0_36 = arith.constant 0 : index
    %c0_37 = arith.constant 0 : index
    %51 = vector.load %arg4[%c0_34, %c3_35, %c0_36, %c0_37] : memref<1x4x2x128xf32, #tpu.memory_space<vmem>>, vector<1x1x2x128xf32>
    %52 = vector.shape_cast %51 : vector<1x1x2x128xf32> to vector<2x128xf32>
    %53 = vector.broadcast %50 : f32 to vector<2x128xf32>
    %54 = arith.mulf %53, %52 : vector<2x128xf32>
    %55 = arith.addf %49, %54 : vector<2x128xf32>
    %c1_38 = arith.constant 1 : index
    %56 = memref.load %arg3[%c1_38] : memref<3xf32, #tpu.memory_space<smem>>
    %57 = vector.broadcast %56 : f32 to vector<2x128xf32>
    %58 = arith.addf %55, %57 : vector<2x128xf32>
    %c0_39 = arith.constant 0 : index
    %c1_40 = arith.constant 1 : index
    %c0_41 = arith.constant 0 : index
    %c0_42 = arith.constant 0 : index
    %59 = vector.load %arg5[%c0_39, %c1_40, %c0_41, %c0_42] : memref<1x3x2x128xf32, #tpu.memory_space<vmem>>, vector<1x1x2x128xf32>
    %60 = vector.shape_cast %59 : vector<1x1x2x128xf32> to vector<2x128xf32>
    %61 = vector.shape_cast %58 : vector<2x128xf32> to vector<1x1x2x128xf32>
    tpu.vector_store %arg5[%c0_39, %c1_40, %c0_41, %c0_42], %61 {strides = array<i32>} : memref<1x3x2x128xf32, #tpu.memory_space<vmem>>, vector<1x1x2x128xf32>,
    %cst_43 = arith.constant 0.000000e+00 : f32
    %62 = vector.broadcast %cst_43 : f32 to vector<2x128xf32>
    %c8 = arith.constant 8 : index
    %63 = memref.load %arg2[%c8] : memref<12xf32, #tpu.memory_space<smem>>
    %c0_44 = arith.constant 0 : index
    %c0_45 = arith.constant 0 : index
    %c0_46 = arith.constant 0 : index
    %c0_47 = arith.constant 0 : index
    %64 = vector.load %arg4[%c0_44, %c0_45, %c0_46, %c0_47] : memref<1x4x2x128xf32, #tpu.memory_space<vmem>>, vector<1x1x2x128xf32>
    %65 = vector.shape_cast %64 : vector<1x1x2x128xf32> to vector<2x128xf32>
    %66 = vector.broadcast %63 : f32 to vector<2x128xf32>
    %67 = arith.mulf %66, %65 : vector<2x128xf32>
    %68 = arith.addf %62, %67 : vector<2x128xf32>
    %c9 = arith.constant 9 : index
    %69 = memref.load %arg2[%c9] : memref<12xf32, #tpu.memory_space<smem>>
    %c0_48 = arith.constant 0 : index
    %c1_49 = arith.constant 1 : index
    %c0_50 = arith.constant 0 : index
    %c0_51 = arith.constant 0 : index
    %70 = vector.load %arg4[%c0_48, %c1_49, %c0_50, %c0_51] : memref<1x4x2x128xf32, #tpu.memory_space<vmem>>, vector<1x1x2x128xf32>
    %71 = vector.shape_cast %70 : vector<1x1x2x128xf32> to vector<2x128xf32>
    %72 = vector.broadcast %69 : f32 to vector<2x128xf32>
    %73 = arith.mulf %72, %71 : vector<2x128xf32>
    %74 = arith.addf %68, %73 : vector<2x128xf32>
    %c10 = arith.constant 10 : index
    %75 = memref.load %arg2[%c10] : memref<12xf32, #tpu.memory_space<smem>>
    %c0_52 = arith.constant 0 : index
    %c2_53 = arith.constant 2 : index
    %c0_54 = arith.constant 0 : index
    %c0_55 = arith.constant 0 : index
    %76 = vector.load %arg4[%c0_52, %c2_53, %c0_54, %c0_55] : memref<1x4x2x128xf32, #tpu.memory_space<vmem>>, vector<1x1x2x128xf32>
    %77 = vector.shape_cast %76 : vector<1x1x2x128xf32> to vector<2x128xf32>
    %78 = vector.broadcast %75 : f32 to vector<2x128xf32>
    %79 = arith.mulf %78, %77 : vector<2x128xf32>
    %80 = arith.addf %74, %79 : vector<2x128xf32>
    %c11 = arith.constant 11 : index
    %81 = memref.load %arg2[%c11] : memref<12xf32, #tpu.memory_space<smem>>
    %c0_56 = arith.constant 0 : index
    %c3_57 = arith.constant 3 : index
    %c0_58 = arith.constant 0 : index
    %c0_59 = arith.constant 0 : index
    %82 = vector.load %arg4[%c0_56, %c3_57, %c0_58, %c0_59] : memref<1x4x2x128xf32, #tpu.memory_space<vmem>>, vector<1x1x2x128xf32>
    %83 = vector.shape_cast %82 : vector<1x1x2x128xf32> to vector<2x128xf32>
    %84 = vector.broadcast %81 : f32 to vector<2x128xf32>
    %85 = arith.mulf %84, %83 : vector<2x128xf32>
    %86 = arith.addf %80, %85 : vector<2x128xf32>
    %c2_60 = arith.constant 2 : index
    %87 = memref.load %arg3[%c2_60] : memref<3xf32, #tpu.memory_space<smem>>
    %88 = vector.broadcast %87 : f32 to vector<2x128xf32>
    %89 = arith.addf %86, %88 : vector<2x128xf32>
    %c0_61 = arith.constant 0 : index
    %c2_62 = arith.constant 2 : index
    %c0_63 = arith.constant 0 : index
    %c0_64 = arith.constant 0 : index
    %90 = vector.load %arg5[%c0_61, %c2_62, %c0_63, %c0_64] : memref<1x3x2x128xf32, #tpu.memory_space<vmem>>, vector<1x1x2x128xf32>
    %91 = vector.shape_cast %90 : vector<1x1x2x128xf32> to vector<2x128xf32>
    %92 = vector.shape_cast %89 : vector<2x128xf32> to vector<1x1x2x128xf32>
    tpu.vector_store %arg5[%c0_61, %c2_62, %c0_63, %c0_64], %92 {strides = array<i32>} : memref<1x3x2x128xf32, #tpu.memory_space<vmem>>, vector<1x1x2x128xf32>,
    return
  }
  func.func @transform_0(%arg0: i32, %arg1: i32) -> i32 {
    %c0_i32 = arith.constant 0 : i32
    %c0_i32_0 = arith.constant 0 : i32
    return %c0_i32 : i32
  }
  func.func @transform_1(%arg0: i32, %arg1: i32) -> i32 {
    %c0_i32 = arith.constant 0 : i32
    %c0_i32_0 = arith.constant 0 : i32
    return %c0_i32 : i32
  }
  func.func @transform_2(%arg0: i32, %arg1: i32) -> (i32, i32, i32, i32) {
    %c0_i32 = arith.constant 0 : i32
    %c0_i32_0 = arith.constant 0 : i32
    %c0_i32_1 = arith.constant 0 : i32
    return %arg0, %c0_i32, %arg1, %c0_i32_0 : i32, i32, i32, i32
  }
  func.func @transform_3(%arg0: i32, %arg1: i32) -> (i32, i32, i32, i32) {
    %c0_i32 = arith.constant 0 : i32
    %c0_i32_0 = arith.constant 0 : i32
    %c0_i32_1 = arith.constant 0 : i32
    return %arg0, %c0_i32, %arg1, %c0_i32_0 : i32, i32, i32, i32
  }
}

</mosaic_0001>

<bundles_post_ra>
// kernel: out_conv_forward.1
= control target key start
LH: loop header
LB: loop body
LE: loop exit
PB: predicated region body
PF: predicated region fallthrough
CT: control target
= control target key end

     0   :  { %8 = vsyncpa [#allocation3], 0  ;;  %s684_s0 = inlined_call_operand.vmem [shape: f32[12], index: 0, kind: input, shape index: {}]   ;;  %s685_s1 = inlined_call_operand.vmem [shape: f32[3], index: 1, kind: input, shape index: {}]   ;;  %s686_s2 = inlined_call_operand.vmem [shape: f32[2,4,2,128], index: 2, kind: input, shape index: {}]   ;;  %s687_s3 = inlined_call_operand.vmem [shape: f32[2,3,2,128], index: 3, kind: output, shape index: {}]  }
   0x1   :  { %9 = vsyncpa [#allocation5], 0  ;;  %s581_s12 = smov 0   ;;  %s583_s13 = smov 0  }
   0x2   :  { %s585_s14 = smov 0  }
   0x3 LB: > { %s412_s15 = sadd.s32 4294967295, %s557_s14   ;;  %s27_s16 = sadd.s32 1, %s553_s13  ;;  %s557_s14 = sphi %s585_s14, %s15_s14   ;;  %s553_s13 = sphi %s583_s13, %s697_s13   ;;  %s549_s12 = sphi %s581_s12, %s696_s12  }
   0x4   : > { %p29_p0 = scmp.ge.s32.totalorder %s27_s16, 2  ;;  %p414_p1 = scmp.ge.s32.totalorder %s557_s14, 1 }
   0x5   : > { %p130_p2 = scmp.lt.s32.totalorder %s557_s14, 3  ;;  %p606_p4 = scmp.eq.s32.totalorder %s412_s15, 0 }
   0x6   : > { %s699_s16 = smov (%p29_p0, %s27_s16), 0  ;;  %s143_s21 = sshll.u32 %s684_s0, 4  ;;  %s144_s21 = int_to_ptr.vmem [resolvable:$true] %s143_s21 }
   0x7   : > { %p602_p3 = pnand %p414_p1, %p130_p2  ;;  %s154_s24 = sshll.u32 %s685_s1, 4  ;;  %s155_s24 = int_to_ptr.vmem [resolvable:$true] %s154_s24 }
   0x8   : > { %s692_s18 = scalar_select %p606_p4, 1, 0 }
   0x9   : > { %s691_s17 = scalar_select %p602_p3, 1, 0 }
   0xa   : > { %p460_p5 = pneg %p602_p3  ;;  %s497_s26 = scalar_lea.vmem %s144_s21, 16 }
   0xb   : > { %p498_p7 = scmp.ne.s32.totalorder %s144_s21, %s497_s26  ;;  %p505_p11 = scmp.lt.s32.totalorder %s144_s21, %s144_s21 }
   0xc   : > { %p620_p6 = pnand %p606_p4, %p460_p5  ;;  %p506_p12 = scmp.lt.s32.totalorder %s497_s26, %s497_s26 }
   0xe   : > { %p499_p8 = pneg %p620_p6  ;;  %p507_p13 = por %p506_p12, %p505_p11 }
  0x10   : > { %p500_p9 = pnand %p499_p8, %p498_p7 }
  0x12   : > { %p501_p10 = pneg %p500_p9 }
  0x14   : > { %p508_p0 = pnand %p507_p13, %p501_p10 }
  0x16   : > { %511 = shalt.err (!%p508_p0)
}
  0x17   : > { %s559_s27 = smov [#allocation2]   ;;  %s512_s28 = scalar_lea.vmem %s155_s24, 16 }
  0x18   : > { %463 = dma.vmem_to_smem (!%p620_p6), %s144_s21, 16, %s559_s27, [#allocation3]  }
  0x19   : > { %p513_p1 = scmp.ne.s32.totalorder %s155_s24, %s512_s28  ;;  %p520_p4 = scmp.lt.s32.totalorder %s155_s24, %s155_s24 }
  0x1a   : > { %p521_p3 = scmp.lt.s32.totalorder %s512_s28, %s512_s28 }
  0x1b   : > { %p515_p2 = pnand %p513_p1, %p499_p8 }
  0x1c   : > { %p522_p7 = por %p521_p3, %p520_p4 }
  0x1d   : > { %p516_p5 = pneg %p515_p2 }
  0x1f   : > { %p523_p9 = pnand %p522_p7, %p516_p5 }
  0x21   : > { %526 = shalt.err (!%p523_p9)
}
  0x22   : > { %s560_s29 = smov [#allocation4]   ;;  %p694_p10 = scmp.ne.s32.totalorder %s691_s17, 0 }
  0x23   : > { %466 = dma.vmem_to_smem (!%p620_p6), %s155_s24, 16, %s560_s29, [#allocation5]  }
  0x24   : > { %178 = sbr.rel (%p694_p10) target bundleno = 74 (0x4a), region = 32  ;;  %p695_p11 = scmp.ne.s32.totalorder (!%p694_p10), %s692_s18, 0 }
  0x2b   : > { %540 = dma.done.wait (%p695_p11), [#allocation3], 16  }
  0x2c   : > { %542 = vsyncadd (%p695_p11), [#allocation3], 4294967280 }
  0x2d   : > { %544 = dma.done.wait (%p695_p11), [#allocation5], 16  }
  0x2e   : > { %546 = vsyncadd (%p695_p11), [#allocation5], 4294967280 }
  0x2f   : > { %188 = sfence }
  0x30   : > { %p213_p3 = scmp.lt.s32.totalorder %s549_s12, 1  ;;  %s229_s30 = sld [smem:[#allocation2]] }
  0x31   : > { %s424_s4 = sld [smem:[#allocation2 + $0x1]]  ;;  %s426_s5 = sld [smem:[#allocation2 + $0x2]] }
  0x32   : > { %s701_s12 = smov (!%p213_p3, %s549_s12), 1  ;;  %s428_s6 = sld [smem:[#allocation2 + $0x3]] }
  0x33   : > { %s450_s7 = sshll.u32 %s701_s12, 3  ;;  %s645_s8 = sld [smem:[#allocation4]] }
  0x34   : > { %s650_s11 = scalar_lea.vmem %s686_s2, %s450_s7  ;;  %s430_s15 = sld [smem:[#allocation2 + $0x4]] }
  0x35   : > { %v230_v0 = vld [vmem:[%s650_s11] sm:$0x3]  ;;  %v425_v2 = vld [vmem:[%s650_s11 + $0x2] sm:$0x3]  ;;  %v427_v3 = vld [vmem:[%s650_s11 + $0x4] sm:$0x3] }
  0x36   : > { %v231_v1 = vstv %s229_s30  ;;  %v429_v7 = vld [vmem:[%s650_s11 + $0x6] sm:$0x3]  ;;  %s431_s17 = sld [smem:[#allocation2 + $0x5]]  ;;  %s433_s18 = sld [smem:[#allocation2 + $0x6]]  ;;  %v257_v11 = vld [vmem:[%s650_s11] sm:$0x3] }
  0x37   : > { %v232_v4 = vmul.f32 %v231_v1, %v230_v0  ;;  %v237_v5 = vstv %s424_s4  ;;  %v243_v6 = vstv %s426_s5  ;;  %s451_s19 = smul.u32 6, %s701_s12  ;;  %s435_s20 = sld [smem:[#allocation2 + $0x7]]  ;;  %v432_v15 = vld [vmem:[%s650_s11 + $0x2] sm:$0x3]  ;;  %v434_v18 = vld [vmem:[%s650_s11 + $0x4] sm:$0x3] }
  0x38   : > { %v238_v8 = vmul.f32 %v425_v2, %v237_v5  ;;  %v244_v9 = vmul.f32 %v427_v3, %v243_v6  ;;  %v249_v10 = vstv %s428_s6  ;;  %s439_s21 = sld [smem:[#allocation2 + $0x8]]  ;;  %s658_s22 = sld [smem:[#allocation2 + $0x9]]  ;;  %v436_v21 = vld [vmem:[%s650_s11 + $0x6] sm:$0x3]  ;;  %v282_v25 = vld [vmem:[%s650_s11] sm:$0x3] }
  0x39   : > { %v250_v13 = vmul.f32 %v429_v7, %v249_v10  ;;  %s661_s23 = sld [smem:[#allocation4 + $0x1]]  ;;  %s442_s24 = sld [smem:[#allocation2 + $0xa]]  ;;  %v253_v19 = vstv %s645_s8  ;;  %v441_v28 = vld [vmem:[%s650_s11 + $0x2] sm:$0x3]  ;;  %v443_v29 = vld [vmem:[%s650_s11 + $0x4] sm:$0x3] }
  0x3a   : > { %v239_v12 = vadd.f32 %v238_v8, %v232_v4  ;;  %v258_v14 = vstv %s430_s15  ;;  %s444_s12 = sld [smem:[#allocation2 + $0xb]]  ;;  %s228_s27 = scalar_lea.vmem %s687_s3, %s451_s19  ;;  %v445_v37 = vld [vmem:[%s650_s11 + $0x6] sm:$0x3] }
  0x3b   : > { %v259_v17 = vmul.f32 %v258_v14, %v257_v11  ;;  %s446_s28 = sld [smem:[#allocation4 + $0x2]] }
  0x3c   : > { %v245_v16 = vadd.f32 %v244_v9, %v239_v12  ;;  %v263_v20 = vstv %s431_s17  ;;  %v268_v24 = vstv %s433_s18 }
  0x3d   : > { %v264_v23 = vmul.f32 %v432_v15, %v263_v20  ;;  %v269_v26 = vmul.f32 %v434_v18, %v268_v24  ;;  %v273_v27 = vstv %s435_s20 }
  0x3e   : > { %v251_v22 = vadd.f32 %v250_v13, %v245_v16  ;;  %v274_v32 = vmul.f32 %v436_v21, %v273_v27  ;;  %v283_v33 = vstv %s439_s21  ;;  %v288_v35 = vstv %s658_s22 }
  0x3f   : > { %v265_v31 = vadd.f32 %v264_v23, %v259_v17  ;;  %v284_v34 = vmul.f32 %v283_v33, %v282_v25  ;;  %v293_v36 = vstv %s442_s24  ;;  %v289_v39 = vmul.f32 %v441_v28, %v288_v35 }
  0x40   : > { %v254_v30 = vadd.f32 %v253_v19, %v251_v22  ;;  %v294_v40 = vmul.f32 %v443_v29, %v293_v36  ;;  %v298_v41 = vstv %s444_s12  ;;  %v277_v42 = vstv %s661_s23 }
  0x41   : > { %v270_v38 = vadd.f32 %v269_v26, %v265_v31  ;;  %v290_v44 = vadd.f32 %v289_v39, %v284_v34  ;;  %v299_v45 = vmul.f32 %v445_v37, %v298_v41  ;;  %v302_v48 = vstv %s446_s28 }
  0x42   : > { %255 = vst [vmem:[%s228_s27] sm:$0x3] %v254_v30 }
  0x43   : > { %v275_v43 = vadd.f32 %v274_v32, %v270_v38  ;;  %v295_v47 = vadd.f32 %v294_v40, %v290_v44 }
  0x45   : > { %v278_v46 = vadd.f32 %v277_v42, %v275_v43  ;;  %v300_v49 = vadd.f32 %v299_v45, %v295_v47 }
  0x47   : > { %438 = vst [vmem:[%s228_s27 + $0x2] sm:$0x3] %v278_v46  ;;  %v303_v50 = vadd.f32 %v302_v48, %v300_v49 }
  0x49   : > { %447 = vst [vmem:[%s228_s27 + $0x4] sm:$0x3] %v303_v50 }
  0x4a PF: > { %s15_s14 = sadd.s32 1, %s557_s14   ;;  %s696_s12 = smov %s553_s13 }
  0x4b   : > { %p12_p4 = scmp.ge.s32.totalorder %s15_s14, 4   ;;  %s697_s13 = smov %s699_s16 }
  0x4d   :  { %14 = sbr.rel (!%p12_p4) target bundleno = 3 (0x3), region = 76 }
  0x54   :  { %333 = vsyncpa [#allocation3], 1 }
  0x55   :  { %335 = vsyncpa [#allocation3 + $0x1], 1 }
  0x56   :  { %336 = vsyncpa [#allocation5], 1 }

</bundles_post_ra>
